<compile_context>
chip_gen: v5e
topology: v5e:2x2
jax: 0.10.0
libtpu: 0.0.40
codegen_flags: <defaults>
</compile_context>

<pallas_src>
import functools

import jax
import jax.numpy as jnp
from jax.experimental import pallas as pl
from jax.experimental.pallas import tpu as pltpu


def _round_up(v, m):
    return ((v + m - 1) // m) * m


def gauss_layer_kernel(x_ref, w_ref, b_ref, o_ref, *, neg_scale_sq, compute_dtype):
    x = x_ref[...]                               # [tn, in_f], natural layout
    w = w_ref[...]                               # [in_f, out_f], grid-invariant
    if compute_dtype is not None:                # in-kernel cast (VPU), not an XLA pass
        x = x.astype(compute_dtype)
        w = w.astype(compute_dtype)
    # MXU matmul with f32 accumulation.
    y = jnp.dot(x, w, preferred_element_type=jnp.float32)   # [tn, out_f]
    y = y + b_ref[...]                                       # bias [1, out_f] broadcast
    # exp(-(scale*y)^2) with scale pre-folded into one negative constant.
    o_ref[...] = jnp.exp(neg_scale_sq * (y * y)).astype(o_ref.dtype)


def gauss_layer(x, weight, bias=None, scale=30.0, *, tile_n=2048,
                compute_dtype=None, out_dtype=None):
    """GaussLayer forward.

    x:      [N, in_features]
    weight: [in_features, out_features]   (transposed from PyTorch's [out, in])
    bias:   [out_features] or None
    returns [N, out_features] = exp(-(scale * (x @ weight + bias))^2)

    compute_dtype: None (default, faithful f32) or e.g. jnp.bfloat16 (opt-in,
                   casts operands inside the kernel before the MXU matmul).
    out_dtype:     None (default: x.dtype) or e.g. jnp.bfloat16 to halve the
                   output writeback traffic.
    """
    N, in_f = x.shape
    in_f_w, out_f = weight.shape
    assert in_f == in_f_w, (x.shape, weight.shape)
    if out_dtype is None:
        out_dtype = x.dtype
    if bias is None:
        bias = jnp.zeros((out_f,), jnp.float32)
    b2 = jnp.asarray(bias, jnp.float32).reshape(1, out_f)    # [1, out_f], f32

    # Row tile: multiple of 128, capped near N (no separate padding pass --
    # Pallas clips the edge tile's DMAs for non-divisible grids).
    tn = _round_up(max(int(tile_n), 128), 128)
    tn = min(tn, _round_up(N, 128))
    # v7x megacore: keep >= 2 grid steps when there's enough work so the
    # "parallel" axis can split across the two TensorCores (no-op on v5e/v6e).
    if N > 256 and pl.cdiv(N, tn) < 2:
        tn = max(128, _round_up(pl.cdiv(N, 2), 128))
    n_tiles = int(pl.cdiv(N, tn))

    kernel = functools.partial(
        gauss_layer_kernel,
        neg_scale_sq=-(float(scale) * float(scale)),
        compute_dtype=compute_dtype,
    )

    cost = pl.CostEstimate(
        flops=2 * N * in_f * out_f,
        transcendentals=N * out_f,
        bytes_accessed=(N * in_f * x.dtype.itemsize
                        + in_f * out_f * weight.dtype.itemsize
                        + out_f * 4
                        + N * out_f * jnp.dtype(out_dtype).itemsize),
    )

    return pl.pallas_call(
        kernel,
        out_shape=jax.ShapeDtypeStruct((N, out_f), out_dtype),
        grid_spec=pltpu.PrefetchScalarGridSpec(
            num_scalar_prefetch=0,
            grid=(n_tiles,),
            in_specs=[
                pl.BlockSpec((tn, in_f), lambda i: (i, 0)),      # x row tile
                pl.BlockSpec((in_f, out_f), lambda i: (0, 0)),   # full W (grid-invariant)
                pl.BlockSpec((1, out_f), lambda i: (0, 0)),      # bias row (f32)
            ],
            out_specs=pl.BlockSpec((tn, out_f), lambda i: (i, 0)),
        ),
        compiler_params=pltpu.CompilerParams(
            dimension_semantics=("parallel",),       # shard row tiles across TCs (v7x)
            vmem_limit_bytes=32 * 1024 * 1024,       # ample even at tile_n=8192
        ),
        cost_estimate=cost,
    )(x, weight, b2)


if __name__ == "__main__":
    # Small shapes consistent with GaussLayer(in_features=32, out_features=32).
    in_features, out_features = 32, 32
    scale = 30.0

    key = jax.random.PRNGKey(0)
    kx, kw, kb, kx2 = jax.random.split(key, 4)

    # Mimic nn.Linear default init: uniform(-1/sqrt(in), 1/sqrt(in)).
    bound = 1.0 / (in_features ** 0.5)
    N = 200                                   # exercises a single partial tile
    x = jax.random.normal(kx, (N, in_features), dtype=jnp.float32)
    weight = jax.random.uniform(
        kw, (in_features, out_features), minval=-bound, maxval=bound,
        dtype=jnp.float32)
    bias = jax.random.uniform(
        kb, (out_features,), minval=-bound, maxval=bound, dtype=jnp.float32)

    def ref_fn(x_, w_, b_):
        return jnp.exp(-((scale * (jnp.dot(x_, w_, precision="highest") + b_)) ** 2))

    # ---- f32 path (default): faithful to the PyTorch forward ----
    out = jax.block_until_ready(gauss_layer(x, weight, bias, scale))
    assert out.shape == (N, out_features)
    assert jnp.allclose(out, ref_fn(x, weight, bias), atol=1e-4, rtol=1e-4)

    # ---- multi-tile path with ragged tail (non-divisible grid, 8 tiles) ----
    N2 = 1000
    x2 = jax.random.normal(kx2, (N2, in_features), dtype=jnp.float32)
    out2 = jax.block_until_ready(gauss_layer(x2, weight, bias, scale, tile_n=128))
    assert out2.shape == (N2, out_features)
    assert jnp.allclose(out2, ref_fn(x2, weight, bias), atol=1e-4, rtol=1e-4)

    # ---- bf16 compute opt-in (documented accuracy tradeoff; in-kernel cast) ----
    out_bf = jax.block_until_ready(
        gauss_layer(x, weight, bias, scale, compute_dtype=jnp.bfloat16))
    xq = x.astype(jnp.bfloat16).astype(jnp.float32)
    wq = weight.astype(jnp.bfloat16).astype(jnp.float32)
    assert jnp.allclose(out_bf, ref_fn(xq, wq, bias), atol=2e-3, rtol=2e-3)

    # ---- bf16 output opt-in (halves writeback; main lever on v5e) ----
    out_b16 = jax.block_until_ready(
        gauss_layer(x, weight, bias, scale, out_dtype=jnp.bfloat16))
    assert out_b16.dtype == jnp.bfloat16
    assert jnp.allclose(out_b16.astype(jnp.float32), ref_fn(x, weight, bias),
                        atol=1e-2, rtol=1e-2)

    print("KERNEL_OK")
</pallas_src>

<mosaic_0001>
module attributes {stable_mosaic.version = 11 : i64} {
  func.func @gauss_layer_kernel(%arg0: i32, %arg1: memref<256x32xf32, #tpu.memory_space<vmem>>, %arg2: memref<32x32xf32, #tpu.memory_space<vmem>>, %arg3: memref<1x32xf32, #tpu.memory_space<vmem>>, %arg4: memref<256x32xf32, #tpu.memory_space<vmem>>) attributes {dimension_semantics = [#tpu.dimension_semantics<parallel>], iteration_bounds = array<i64: 1>, scalar_prefetch = 0 : i64, scratch_operands = 0 : i64, tpu.core_type = #tpu.core_type<tc>, window_params = [{transform_indices = @transform_0, window_bounds = array<i64: 256, 32>}, {pipeline_mode = #tpu.pipeline_mode<synchronous>, transform_indices = @transform_1, window_bounds = array<i64: 32, 32>}, {pipeline_mode = #tpu.pipeline_mode<synchronous>, transform_indices = @transform_2, window_bounds = array<i64: 1, 32>}, {transform_indices = @transform_3, window_bounds = array<i64: 256, 32>}]} {
    %c0 = arith.constant 0 : index
    %c0_0 = arith.constant 0 : index
    %0 = vector.load %arg1[%c0, %c0_0] : memref<256x32xf32, #tpu.memory_space<vmem>>, vector<256x32xf32>
    %c0_1 = arith.constant 0 : index
    %c0_2 = arith.constant 0 : index
    %1 = vector.load %arg2[%c0_1, %c0_2] : memref<32x32xf32, #tpu.memory_space<vmem>>, vector<32x32xf32>
    %cst = arith.constant dense<0.000000e+00> : vector<256x32xf32>
    %2 = tpu.matmul %0, %1, %cst {dimension_numbers = #tpu.dot_dimension_numbers<[1], [0], [0], [1], [0, 0, 1, 1], [], []>} : vector<256x32xf32>, vector<32x32xf32>, vector<256x32xf32> -> vector<256x32xf32>
    %c0_3 = arith.constant 0 : index
    %c0_4 = arith.constant 0 : index
    %3 = vector.load %arg3[%c0_3, %c0_4] : memref<1x32xf32, #tpu.memory_space<vmem>>, vector<1x32xf32>
    %4 = vector.broadcast %3 : vector<1x32xf32> to vector<256x32xf32>
    %5 = arith.addf %2, %4 : vector<256x32xf32>
    %6 = arith.mulf %5, %5 : vector<256x32xf32>
    %cst_5 = arith.constant -9.000000e+02 : f32
    %7 = vector.broadcast %cst_5 : f32 to vector<256x32xf32>
    %8 = arith.mulf %7, %6 : vector<256x32xf32>
    %9 = math.exp %8 : vector<256x32xf32>
    %c0_6 = arith.constant 0 : index
    %c0_7 = arith.constant 0 : index
    %10 = vector.load %arg4[%c0_6, %c0_7] : memref<256x32xf32, #tpu.memory_space<vmem>>, vector<256x32xf32>
    tpu.vector_store %arg4[%c0_6, %c0_7], %9 {strides = array<i32>} : memref<256x32xf32, #tpu.memory_space<vmem>>, vector<256x32xf32>,
    return
  }
  func.func @transform_0(%arg0: i32) -> (i32, i32) {
    %c0_i32 = arith.constant 0 : i32
    %c0_i32_0 = arith.constant 0 : i32
    return %arg0, %c0_i32 : i32, i32
  }
  func.func @transform_1(%arg0: i32) -> (i32, i32) {
    %c0_i32 = arith.constant 0 : i32
    %c0_i32_0 = arith.constant 0 : i32
    %c0_i32_1 = arith.constant 0 : i32
    return %c0_i32, %c0_i32_0 : i32, i32
  }
  func.func @transform_2(%arg0: i32) -> (i32, i32) {
    %c0_i32 = arith.constant 0 : i32
    %c0_i32_0 = arith.constant 0 : i32
    %c0_i32_1 = arith.constant 0 : i32
    return %c0_i32, %c0_i32_0 : i32, i32
  }
  func.func @transform_3(%arg0: i32) -> (i32, i32) {
    %c0_i32 = arith.constant 0 : i32
    %c0_i32_0 = arith.constant 0 : i32
    return %arg0, %c0_i32 : i32, i32
  }
}

</mosaic_0001>

<bundles_post_ra>
// kernel: tpu_custom_call.1
= control target key start
LH: loop header
LB: loop body
LE: loop exit
PB: predicated region body
PF: predicated region fallthrough
CT: control target
= control target key end

     0   :  { %vm54_vm0 = vcmask 261120   ;;  %s967_s0 = inlined_call_operand.vmem [shape: f32[200,32], index: 0, kind: input, shape index: {}]   ;;  %s968_s1 = inlined_call_operand.vmem [shape: f32[32,32], index: 1, kind: input, shape index: {}]   ;;  %s969_s2 = inlined_call_operand.vmem [shape: f32[1,32], index: 2, kind: input, shape index: {}]   ;;  %s970_s3 = inlined_call_operand.vmem [shape: f32[200,32], index: 3, kind: output, shape index: {}]  }
   0x1   :  { %v49_v0 = vld [vmem:[%s968_s1 + $0x18] sm:$0xff]  ;;  %v48_v1 = vld [vmem:[%s968_s1 + $0x10] sm:$0xff]  ;;  %v47_v2 = vld [vmem:[%s968_s1 + $0x8] sm:$0xff] }
   0x2   :  { %594 = vmatpush.msra.mxu2 %v49_v0  ;;  %163 = vmatpush.msra.mxu0 %v49_v0  ;;  %v46_v3 = vld [vmem:[%s968_s1] sm:$0xff]  ;;  %v31_v8 = vld [vmem:[%s967_s0 + $0x88] sm:$0xff]  ;;  %v32_v12 = vld [vmem:[%s967_s0 + $0x90] sm:$0xff] }
   0x3   :  { %593 = vmatpush.msra.mxu1 %v49_v0  ;;  %595 = vmatpush.msra.mxu3 %v49_v0  ;;  %v30_v4 = vld [vmem:[%s967_s0 + $0x80] sm:$0xff]  ;;  %v15_v9 = vld [vmem:[%s967_s0 + $0x8] sm:$0xff]  ;;  %v16_v13 = vld [vmem:[%s967_s0 + $0x10] sm:$0xff] }
   0x4   :  { %597 = vmatpush.msra.mxu2 %v48_v1  ;;  %164 = vmatpush.msra.mxu0 %v48_v1  ;;  %v14_v5 = vld [vmem:[%s967_s0] sm:$0xff]  ;;  %v23_v10 = vld [vmem:[%s967_s0 + $0x48] sm:$0xff]  ;;  %v24_v14 = vld [vmem:[%s967_s0 + $0x50] sm:$0xff] }
   0x5   :  { %596 = vmatpush.msra.mxu1 %v48_v1  ;;  %598 = vmatpush.msra.mxu3 %v48_v1  ;;  %v22_v6 = vld [vmem:[%s967_s0 + $0x40] sm:$0xff]  ;;  %v39_v11 = vld [vmem:[%s967_s0 + $0xc8] sm:$0xff]  ;;  %v40_v15 = vld [vmem:[%s967_s0 + $0xd0] sm:$0xff] }
   0x6   :  { %600 = vmatpush.msra.mxu2 %v47_v2  ;;  %165 = vmatpush.msra.mxu0 %v47_v2  ;;  %v38_v7 = vld [vmem:[%s967_s0 + $0xc0] sm:$0xff]  ;;  %v33_v16 = vld [vmem:[%s967_s0 + $0x98] sm:$0xff]  ;;  %v35_v24 = vld [vmem:[%s967_s0 + $0xa8] sm:$0xff] }
   0x7   :  { %599 = vmatpush.msra.mxu1 %v47_v2  ;;  %601 = vmatpush.msra.mxu3 %v47_v2  ;;  %v17_v17 = vld [vmem:[%s967_s0 + $0x18] sm:$0xff]  ;;  %v34_v20 = vld [vmem:[%s967_s0 + $0xa0] sm:$0xff]  ;;  %v19_v25 = vld [vmem:[%s967_s0 + $0x28] sm:$0xff] }
   0x8   :  { %603 = vmatpush.msra.mxu2 %v46_v3  ;;  %166 = vmatpush.msra.mxu0 %v46_v3  ;;  %v25_v18 = vld [vmem:[%s967_s0 + $0x58] sm:$0xff]  ;;  %v18_v21 = vld [vmem:[%s967_s0 + $0x20] sm:$0xff]  ;;  %v27_v26 = vld [vmem:[%s967_s0 + $0x68] sm:$0xff] }
   0x9   :  { %577 = vmatmul.msk.f32.vlgmr.msra.gmra.mxu2 %vm54_vm0, %v30_v4  ;;  %602 = vmatpush.msra.mxu1 %v46_v3  ;;  %v41_v19 = vld [vmem:[%s967_s0 + $0xd8] sm:$0xff]  ;;  %v26_v22 = vld [vmem:[%s967_s0 + $0x60] sm:$0xff]  ;;  %v43_v27 = vld [vmem:[%s967_s0 + $0xe8] sm:$0xff] }
   0xa   :  { %561 = vmatmul.msk.f32.vlgmr.msra.gmra.mxu0 %vm54_vm0, %v14_v5  ;;  %569 = vmatmul.msk.f32.vlgmr.msra.gmra.mxu1 %vm54_vm0, %v22_v6  ;;  %v42_v23 = vld [vmem:[%s967_s0 + $0xe0] sm:$0xff]  ;;  %v36_v28 = vld [vmem:[%s967_s0 + $0xb0] sm:$0xff]  ;;  %v37_v32 = vld [vmem:[%s967_s0 + $0xb8] sm:$0xff] }
   0xb   :  { %604 = vmatpush.msra.mxu3 %v46_v3  ;;  %v20_v29 = vld [vmem:[%s967_s0 + $0x30] sm:$0xff]  ;;  %v21_v33 = vld [vmem:[%s967_s0 + $0x38] sm:$0xff]  ;;  %v833_v36 = vld [vmem:[%s969_s2] ss:$0 sm:$0xff] }
   0xc   :  { %585 = vmatmul.msk.f32.vlgmr.msra.gmra.mxu3 %vm54_vm0, %v38_v7  ;;  %v28_v30 = vld [vmem:[%s967_s0 + $0x70] sm:$0xff]  ;;  %v29_v34 = vld [vmem:[%s967_s0 + $0x78] sm:$0xff] }
   0xd   :  { %v44_v31 = vld [vmem:[%s967_s0 + $0xf0] sm:$0xff]  ;;  %v45_v35 = vld [vmem:[%s967_s0 + $0xf8] sm:$0xff] }
  0x11   :  { %578 = vmatmul.msk.f32.gmra.mxu2 %vm54_vm0, %v31_v8 }
  0x12   :  { %562 = vmatmul.msk.f32.gmra.mxu0 %vm54_vm0, %v15_v9  ;;  %570 = vmatmul.msk.f32.gmra.mxu1 %vm54_vm0, %v23_v10 }
  0x14   :  { %586 = vmatmul.msk.f32.gmra.mxu3 %vm54_vm0, %v39_v11 }
  0x19   :  { %579 = vmatmul.msk.f32.gmra.mxu2 %vm54_vm0, %v32_v12 }
  0x1a   :  { %563 = vmatmul.msk.f32.gmra.mxu0 %vm54_vm0, %v16_v13  ;;  %571 = vmatmul.msk.f32.gmra.mxu1 %vm54_vm0, %v24_v14 }
  0x1c   :  { %587 = vmatmul.msk.f32.gmra.mxu3 %vm54_vm0, %v40_v15 }
  0x21   :  { %580 = vmatmul.msk.f32.gmra.mxu2 %vm54_vm0, %v33_v16 }
  0x22   :  { %564 = vmatmul.msk.f32.gmra.mxu0 %vm54_vm0, %v17_v17  ;;  %572 = vmatmul.msk.f32.gmra.mxu1 %vm54_vm0, %v25_v18 }
  0x24   :  { %588 = vmatmul.msk.f32.gmra.mxu3 %vm54_vm0, %v41_v19 }
  0x29   :  { %581 = vmatmul.msk.f32.gmra.mxu2 %vm54_vm0, %v34_v20 }
  0x2a   :  { %565 = vmatmul.msk.f32.gmra.mxu0 %vm54_vm0, %v18_v21  ;;  %573 = vmatmul.msk.f32.gmra.mxu1 %vm54_vm0, %v26_v22 }
  0x2c   :  { %589 = vmatmul.msk.f32.gmra.mxu3 %vm54_vm0, %v42_v23 }
  0x31   :  { %582 = vmatmul.msk.f32.gmra.mxu2 %vm54_vm0, %v35_v24 }
  0x32   :  { %566 = vmatmul.msk.f32.gmra.mxu0 %vm54_vm0, %v19_v25  ;;  %574 = vmatmul.msk.f32.gmra.mxu1 %vm54_vm0, %v27_v26 }
  0x34   :  { %590 = vmatmul.msk.f32.gmra.mxu3 %vm54_vm0, %v43_v27 }
  0x39   :  { %583 = vmatmul.msk.f32.gmra.mxu2 %vm54_vm0, %v36_v28 }
  0x3a   :  { %567 = vmatmul.msk.f32.gmra.mxu0 %vm54_vm0, %v20_v29  ;;  %575 = vmatmul.msk.f32.gmra.mxu1 %vm54_vm0, %v28_v30 }
  0x3c   :  { %591 = vmatmul.msk.f32.gmra.mxu3 %vm54_vm0, %v44_v31 }
  0x41   :  { %584 = vmatmul.msk.f32.gmra.mxu2 %vm54_vm0, %v37_v32 }
  0x42   :  { %568 = vmatmul.msk.f32.gmra.mxu0 %vm54_vm0, %v21_v33  ;;  %576 = vmatmul.msk.f32.gmra.mxu1 %vm54_vm0, %v29_v34 }
  0x44   :  { %592 = vmatmul.msk.f32.gmra.mxu3 %vm54_vm0, %v45_v35 }
  0x87   :  { %v168_v37 = vpop.f32.mrf.mxu0  ;;  %v192_v38 = vpop.f32.mrf.mxu1 }
  0x88   :  { %v169_v39 = vadd.f32 %v833_v36, %v168_v37  ;;  %v193_v40 = vadd.f32 %v833_v36, %v192_v38 }
  0x8a   :  { %v264_v41 = vmul.f32 %v169_v39, %v169_v39  ;;  %v272_v42 = vmul.f32 %v193_v40, %v193_v40 }
  0x8c   :  { %v296_v43 = vmul.f32 -900.0, %v264_v41  ;;  %v304_v44 = vmul.f32 -900.0, %v272_v42  ;;  %v216_v45 = vpop.f32.mrf.mxu2 }
  0x8d   :  { %v217_v46 = vadd.f32 %v833_v36, %v216_v45 }
  0x8e   :  { %v328_v47 = vmul.f32 1.442695, %v296_v43  ;;  %v344_v48 = vmul.f32 1.442695, %v304_v44 }
  0x8f   :  { %v280_v49 = vmul.f32 %v217_v46, %v217_v46  ;;  %v171_v50 = vpop.f32.mrf.mxu0  ;;  %v195_v51 = vpop.f32.mrf.mxu1 }
  0x90   :  { %606 = vpow2.f32 %v328_v47  ;;  %v172_v52 = vadd.f32 %v833_v36, %v171_v50  ;;  %v196_v53 = vadd.f32 %v833_v36, %v195_v51  ;;  %v240_v54 = vpop.f32.mrf.mxu3 }
  0x91   :  { %608 = vpow2.f32 %v344_v48  ;;  %v312_v55 = vmul.f32 -900.0, %v280_v49  ;;  %v241_v56 = vadd.f32 %v833_v36, %v240_v54 }
  0x92   :  { %v265_v57 = vmul.f32 %v172_v52, %v172_v52  ;;  %v273_v58 = vmul.f32 %v196_v53, %v196_v53 }
  0x93   :  { %v360_v59 = vmul.f32 1.442695, %v312_v55  ;;  %v288_v60 = vmul.f32 %v241_v56, %v241_v56 }
  0x94   :  { %v297_v61 = vmul.f32 -900.0, %v265_v57  ;;  %v305_v62 = vmul.f32 -900.0, %v273_v58  ;;  %v219_v63 = vpop.f32.mrf.mxu2 }
  0x95   :  { %610 = vpow2.f32 %v360_v59  ;;  %v220_v0 = vadd.f32 %v833_v36, %v219_v63  ;;  %v320_v1 = vmul.f32 -900.0, %v288_v60 }
  0x96   :  { %v607_v2 = vpop.eup %606  ;;  %v330_v3 = vmul.f32 1.442695, %v297_v61  ;;  %v346_v4 = vmul.f32 1.442695, %v305_v62 }
  0x97   :  { %v609_v5 = vpop.eup %608  ;;  %392 = vst.msk [vmem:[#allocation2] sm:$0xff] %vm54_vm0, %v607_v2  ;;  %v281_v6 = vmul.f32 %v220_v0, %v220_v0  ;;  %v376_v7 = vmul.f32 1.442695, %v320_v1  ;;  %v174_v8 = vpop.f32.mrf.mxu0 }
  0x98   :  { %v198_v9 = vpop.f32.mrf.mxu1  ;;  %400 = vst.msk [vmem:[#allocation2 + $0x40] sm:$0xff] %vm54_vm0, %v609_v5  ;;  %612 = vpow2.f32 %v330_v3  ;;  %v175_v10 = vadd.f32 %v833_v36, %v174_v8  ;;  %v243_v12 = vpop.f32.mrf.mxu3 }
  0x99   :  { %v199_v11 = vadd.f32 %v833_v36, %v198_v9  ;;  %614 = vpow2.f32 %v346_v4  ;;  %v313_v13 = vmul.f32 -900.0, %v281_v6  ;;  %v244_v14 = vadd.f32 %v833_v36, %v243_v12 }
  0x9a   :  { %616 = vpow2.f32 %v376_v7  ;;  %v266_v15 = vmul.f32 %v175_v10, %v175_v10 }
  0x9b   :  { %v274_v16 = vmul.f32 %v199_v11, %v199_v11  ;;  %v611_v17 = vpop.eup %610  ;;  %v362_v18 = vmul.f32 1.442695, %v313_v13  ;;  %v289_v19 = vmul.f32 %v244_v14, %v244_v14 }
  0x9c   :  { %408 = vst.msk [vmem:[#allocation2 + $0x80] sm:$0xff] %vm54_vm0, %v611_v17  ;;  %v298_v20 = vmul.f32 -900.0, %v266_v15  ;;  %v222_v22 = vpop.f32.mrf.mxu2 }
  0x9d   :  { %v306_v21 = vmul.f32 -900.0, %v274_v16  ;;  %618 = vpow2.f32 %v362_v18  ;;  %v223_v23 = vadd.f32 %v833_v36, %v222_v22  ;;  %v321_v24 = vmul.f32 -900.0, %v289_v19 }
  0x9e   :  { %v613_v25 = vpop.eup %612  ;;  %v502_v26 = vld [vmem:[#allocation2] sm:$0xff]  ;;  %v332_v27 = vmul.f32 1.442695, %v298_v20 }
  0x9f   :  { %v348_v28 = vmul.f32 1.442695, %v306_v21  ;;  %v615_v29 = vpop.eup %614  ;;  %503 = vst [vmem:[%s970_s3] sm:$0xff] %v502_v26  ;;  %v518_v30 = vld [vmem:[#allocation2 + $0x40] sm:$0xff]  ;;  %v282_v31 = vmul.f32 %v223_v23, %v223_v23  ;;  %v177_v32 = vpop.f32.mrf.mxu0  ;;  %v378_v35 = vmul.f32 1.442695, %v321_v24 }
  0xa0   :  { %v201_v33 = vpop.f32.mrf.mxu1  ;;  %v617_v34 = vpop.eup %616  ;;  %519 = vst [vmem:[%s970_s3 + $0x40] sm:$0xff] %v518_v30  ;;  %620 = vpow2.f32 %v332_v27  ;;  %v178_v37 = vadd.f32 %v833_v36, %v177_v32 }
  0xa1   :  { %v202_v38 = vadd.f32 %v833_v36, %v201_v33  ;;  %v246_v39 = vpop.f32.mrf.mxu3  ;;  %393 = vst.msk [vmem:[#allocation2 + $0x8] sm:$0xff] %vm54_vm0, %v613_v25  ;;  %622 = vpow2.f32 %v348_v28  ;;  %v314_v40 = vmul.f32 -900.0, %v282_v31 }
  0xa2   :  { %v247_v41 = vadd.f32 %v833_v36, %v246_v39  ;;  %401 = vst.msk [vmem:[#allocation2 + $0x48] sm:$0xff] %vm54_vm0, %v615_v29  ;;  %v267_v42 = vmul.f32 %v178_v37, %v178_v37  ;;  %624 = vpow2.f32 %v378_v35 }
  0xa3   :  { %v275_v43 = vmul.f32 %v202_v38, %v202_v38  ;;  %v619_v44 = vpop.eup %618  ;;  %v534_v45 = vld [vmem:[#allocation2 + $0x80] sm:$0xff]  ;;  %416 = vst.msk [vmem:[#allocation2 + $0xc0] sm:$0xff] %vm54_vm0, %v617_v34  ;;  %v364_v46 = vmul.f32 1.442695, %v314_v40 }
  0xa4   :  { %v290_v47 = vmul.f32 %v247_v41, %v247_v41  ;;  %535 = vst [vmem:[%s970_s3 + $0x80] sm:$0xff] %v534_v45  ;;  %v299_v48 = vmul.f32 -900.0, %v267_v42  ;;  %v225_v50 = vpop.f32.mrf.mxu2 }
  0xa5   :  { %v307_v49 = vmul.f32 -900.0, %v275_v43  ;;  %409 = vst.msk [vmem:[#allocation2 + $0x88] sm:$0xff] %vm54_vm0, %v619_v44  ;;  %626 = vpow2.f32 %v364_v46  ;;  %v226_v51 = vadd.f32 %v833_v36, %v225_v50 }
  0xa6   :  { %v322_v52 = vmul.f32 -900.0, %v290_v47  ;;  %v621_v53 = vpop.eup %620  ;;  %v334_v54 = vmul.f32 1.442695, %v299_v48 }
  0xa7   :  { %v350_v55 = vmul.f32 1.442695, %v307_v49  ;;  %v623_v56 = vpop.eup %622  ;;  %394 = vst.msk [vmem:[#allocation2 + $0x10] sm:$0xff] %vm54_vm0, %v621_v53  ;;  %v283_v57 = vmul.f32 %v226_v51, %v226_v51  ;;  %v180_v59 = vpop.f32.mrf.mxu0 }
  0xa8   :  { %v380_v58 = vmul.f32 1.442695, %v322_v52  ;;  %v204_v60 = vpop.f32.mrf.mxu1  ;;  %v504_v61 = vld [vmem:[#allocation2 + $0x8] sm:$0xff]  ;;  %402 = vst.msk [vmem:[#allocation2 + $0x50] sm:$0xff] %vm54_vm0, %v623_v56  ;;  %628 = vpow2.f32 %v334_v54  ;;  %v181_v62 = vadd.f32 %v833_v36, %v180_v59  ;;  %v625_v4 = vpop.eup %624 }
  0xa9   :  { %v205_v63 = vadd.f32 %v833_v36, %v204_v60  ;;  %v249_v0 = vpop.f32.mrf.mxu3  ;;  %505 = vst [vmem:[%s970_s3 + $0x8] sm:$0xff] %v504_v61  ;;  %v520_v1 = vld [vmem:[#allocation2 + $0x48] sm:$0xff]  ;;  %630 = vpow2.f32 %v350_v55  ;;  %v315_v2 = vmul.f32 -900.0, %v283_v57 }
  0xaa   :  { %v250_v3 = vadd.f32 %v833_v36, %v249_v0  ;;  %521 = vst [vmem:[%s970_s3 + $0x48] sm:$0xff] %v520_v1  ;;  %v550_v5 = vld [vmem:[#allocation2 + $0xc0] sm:$0xff]  ;;  %632 = vpow2.f32 %v380_v58  ;;  %v268_v6 = vmul.f32 %v181_v62, %v181_v62 }
  0xab   :  { %v276_v7 = vmul.f32 %v205_v63, %v205_v63  ;;  %v627_v8 = vpop.eup %626  ;;  %551 = vst [vmem:[%s970_s3 + $0xc0] sm:$0xff] %v550_v5  ;;  %v366_v9 = vmul.f32 1.442695, %v315_v2 }
  0xac   :  { %v291_v10 = vmul.f32 %v250_v3, %v250_v3  ;;  %v536_v11 = vld [vmem:[#allocation2 + $0x88] sm:$0xff]  ;;  %410 = vst.msk [vmem:[#allocation2 + $0x90] sm:$0xff] %vm54_vm0, %v627_v8  ;;  %v300_v12 = vmul.f32 -900.0, %v268_v6  ;;  %v228_v14 = vpop.f32.mrf.mxu2 }
  0xad   :  { %v308_v13 = vmul.f32 -900.0, %v276_v7  ;;  %537 = vst [vmem:[%s970_s3 + $0x88] sm:$0xff] %v536_v11  ;;  %634 = vpow2.f32 %v366_v9  ;;  %v229_v15 = vadd.f32 %v833_v36, %v228_v14 }
  0xae   :  { %v323_v16 = vmul.f32 -900.0, %v291_v10  ;;  %v629_v17 = vpop.eup %628  ;;  %v506_v18 = vld [vmem:[#allocation2 + $0x10] sm:$0xff]  ;;  %v336_v19 = vmul.f32 1.442695, %v300_v12 }
  0xaf   :  { %v352_v20 = vmul.f32 1.442695, %v308_v13  ;;  %v631_v21 = vpop.eup %630  ;;  %507 = vst [vmem:[%s970_s3 + $0x10] sm:$0xff] %v506_v18  ;;  %v522_v22 = vld [vmem:[#allocation2 + $0x50] sm:$0xff]  ;;  %v284_v23 = vmul.f32 %v229_v15, %v229_v15  ;;  %v183_v25 = vpop.f32.mrf.mxu0 }
  0xb0   :  { %v382_v24 = vmul.f32 1.442695, %v323_v16  ;;  %v207_v26 = vpop.f32.mrf.mxu1  ;;  %v633_v27 = vpop.eup %632  ;;  %523 = vst [vmem:[%s970_s3 + $0x50] sm:$0xff] %v522_v22  ;;  %636 = vpow2.f32 %v336_v19  ;;  %v184_v28 = vadd.f32 %v833_v36, %v183_v25 }
  0xb1   :  { %v208_v29 = vadd.f32 %v833_v36, %v207_v26  ;;  %v252_v30 = vpop.f32.mrf.mxu3  ;;  %395 = vst.msk [vmem:[#allocation2 + $0x18] sm:$0xff] %vm54_vm0, %v629_v17  ;;  %638 = vpow2.f32 %v352_v20  ;;  %v316_v31 = vmul.f32 -900.0, %v284_v23 }
  0xb2   :  { %v253_v32 = vadd.f32 %v833_v36, %v252_v30  ;;  %403 = vst.msk [vmem:[#allocation2 + $0x58] sm:$0xff] %vm54_vm0, %v631_v21  ;;  %640 = vpow2.f32 %v382_v24  ;;  %v269_v33 = vmul.f32 %v184_v28, %v184_v28 }
  0xb3   :  { %v277_v34 = vmul.f32 %v208_v29, %v208_v29  ;;  %v635_v35 = vpop.eup %634  ;;  %v538_v37 = vld [vmem:[#allocation2 + $0x90] sm:$0xff]  ;;  %v368_v38 = vmul.f32 1.442695, %v316_v31 }
  0xb4   :  { %v292_v39 = vmul.f32 %v253_v32, %v253_v32  ;;  %539 = vst [vmem:[%s970_s3 + $0x90] sm:$0xff] %v538_v37  ;;  %v301_v40 = vmul.f32 -900.0, %v269_v33  ;;  %v231_v42 = vpop.f32.mrf.mxu2 }
  0xb5   :  { %v309_v41 = vmul.f32 -900.0, %v277_v34  ;;  %411 = vst.msk [vmem:[#allocation2 + $0x98] sm:$0xff] %vm54_vm0, %v635_v35  ;;  %642 = vpow2.f32 %v368_v38  ;;  %v232_v43 = vadd.f32 %v833_v36, %v231_v42 }
  0xb6   :  { %v324_v44 = vmul.f32 -900.0, %v292_v39  ;;  %v637_v45 = vpop.eup %636  ;;  %v338_v46 = vmul.f32 1.442695, %v301_v40 }
  0xb7   :  { %v354_v47 = vmul.f32 1.442695, %v309_v41  ;;  %v639_v48 = vpop.eup %638  ;;  %396 = vst.msk [vmem:[#allocation2 + $0x20] sm:$0xff] %vm54_vm0, %v637_v45  ;;  %v285_v49 = vmul.f32 %v232_v43, %v232_v43  ;;  %v186_v51 = vpop.f32.mrf.mxu0 }
  0xb8   :  { %v384_v50 = vmul.f32 1.442695, %v324_v44  ;;  %v210_v52 = vpop.f32.mrf.mxu1  ;;  %v641_v53 = vpop.eup %640  ;;  %v508_v54 = vld [vmem:[#allocation2 + $0x18] sm:$0xff]  ;;  %404 = vst.msk [vmem:[#allocation2 + $0x60] sm:$0xff] %vm54_vm0, %v639_v48  ;;  %644 = vpow2.f32 %v338_v46  ;;  %v187_v55 = vadd.f32 %v833_v36, %v186_v51 }
  0xb9   :  { %v211_v56 = vadd.f32 %v833_v36, %v210_v52  ;;  %v255_v57 = vpop.f32.mrf.mxu3  ;;  %509 = vst [vmem:[%s970_s3 + $0x18] sm:$0xff] %v508_v54  ;;  %v524_v58 = vld [vmem:[#allocation2 + $0x58] sm:$0xff]  ;;  %646 = vpow2.f32 %v354_v47  ;;  %v317_v59 = vmul.f32 -900.0, %v285_v49 }
  0xba   :  { %v256_v60 = vadd.f32 %v833_v36, %v255_v57  ;;  %525 = vst [vmem:[%s970_s3 + $0x58] sm:$0xff] %v524_v58  ;;  %648 = vpow2.f32 %v384_v50  ;;  %v270_v61 = vmul.f32 %v187_v55, %v187_v55 }
  0xbb   :  { %v278_v62 = vmul.f32 %v211_v56, %v211_v56  ;;  %v643_v63 = vpop.eup %642  ;;  %v370_v0 = vmul.f32 1.442695, %v317_v59 }
  0xbc   :  { %v293_v1 = vmul.f32 %v256_v60, %v256_v60  ;;  %v540_v2 = vld [vmem:[#allocation2 + $0x98] sm:$0xff]  ;;  %412 = vst.msk [vmem:[#allocation2 + $0xa0] sm:$0xff] %vm54_vm0, %v643_v63  ;;  %v302_v3 = vmul.f32 -900.0, %v270_v61  ;;  %v234_v5 = vpop.f32.mrf.mxu2 }
  0xbd   :  { %v310_v4 = vmul.f32 -900.0, %v278_v62  ;;  %541 = vst [vmem:[%s970_s3 + $0x98] sm:$0xff] %v540_v2  ;;  %650 = vpow2.f32 %v370_v0  ;;  %v235_v6 = vadd.f32 %v833_v36, %v234_v5 }
  0xbe   :  { %v325_v7 = vmul.f32 -900.0, %v293_v1  ;;  %v645_v8 = vpop.eup %644  ;;  %v510_v9 = vld [vmem:[#allocation2 + $0x20] sm:$0xff]  ;;  %v340_v10 = vmul.f32 1.442695, %v302_v3 }
  0xbf   :  { %v356_v11 = vmul.f32 1.442695, %v310_v4  ;;  %v647_v12 = vpop.eup %646  ;;  %511 = vst [vmem:[%s970_s3 + $0x20] sm:$0xff] %v510_v9  ;;  %v526_v13 = vld [vmem:[#allocation2 + $0x60] sm:$0xff]  ;;  %v286_v14 = vmul.f32 %v235_v6, %v235_v6  ;;  %v189_v16 = vpop.f32.mrf.mxu0 }
  0xc0   :  { %v386_v15 = vmul.f32 1.442695, %v325_v7  ;;  %v213_v17 = vpop.f32.mrf.mxu1  ;;  %v649_v18 = vpop.eup %648  ;;  %527 = vst [vmem:[%s970_s3 + $0x60] sm:$0xff] %v526_v13  ;;  %652 = vpow2.f32 %v340_v10  ;;  %v190_v19 = vadd.f32 %v833_v36, %v189_v16 }
  0xc1   :  { %v214_v20 = vadd.f32 %v833_v36, %v213_v17  ;;  %v258_v21 = vpop.f32.mrf.mxu3  ;;  %397 = vst.msk [vmem:[#allocation2 + $0x28] sm:$0xff] %vm54_vm0, %v645_v8  ;;  %654 = vpow2.f32 %v356_v11  ;;  %v318_v22 = vmul.f32 -900.0, %v286_v14 }
  0xc2   :  { %v259_v23 = vadd.f32 %v833_v36, %v258_v21  ;;  %405 = vst.msk [vmem:[#allocation2 + $0x68] sm:$0xff] %vm54_vm0, %v647_v12  ;;  %656 = vpow2.f32 %v386_v15  ;;  %v271_v24 = vmul.f32 %v190_v19, %v190_v19 }
  0xc3   :  { %v279_v25 = vmul.f32 %v214_v20, %v214_v20  ;;  %v651_v26 = vpop.eup %650  ;;  %v542_v27 = vld [vmem:[#allocation2 + $0xa0] sm:$0xff]  ;;  %v372_v28 = vmul.f32 1.442695, %v318_v22 }
  0xc4   :  { %v294_v29 = vmul.f32 %v259_v23, %v259_v23  ;;  %543 = vst [vmem:[%s970_s3 + $0xa0] sm:$0xff] %v542_v27  ;;  %v303_v30 = vmul.f32 -900.0, %v271_v24  ;;  %v237_v32 = vpop.f32.mrf.mxu2 }
  0xc5   :  { %v311_v31 = vmul.f32 -900.0, %v279_v25  ;;  %413 = vst.msk [vmem:[#allocation2 + $0xa8] sm:$0xff] %vm54_vm0, %v651_v26  ;;  %658 = vpow2.f32 %v372_v28  ;;  %v238_v33 = vadd.f32 %v833_v36, %v237_v32 }
  0xc6   :  { %v326_v34 = vmul.f32 -900.0, %v294_v29  ;;  %v653_v35 = vpop.eup %652  ;;  %v342_v37 = vmul.f32 1.442695, %v303_v30 }
  0xc7   :  { %v358_v38 = vmul.f32 1.442695, %v311_v31  ;;  %v655_v39 = vpop.eup %654  ;;  %398 = vst.msk [vmem:[#allocation2 + $0x30] sm:$0xff] %vm54_vm0, %v653_v35  ;;  %v287_v40 = vmul.f32 %v238_v33, %v238_v33 }
  0xc8   :  { %v388_v41 = vmul.f32 1.442695, %v326_v34  ;;  %v657_v42 = vpop.eup %656  ;;  %v512_v43 = vld [vmem:[#allocation2 + $0x28] sm:$0xff]  ;;  %406 = vst.msk [vmem:[#allocation2 + $0x70] sm:$0xff] %vm54_vm0, %v655_v39  ;;  %660 = vpow2.f32 %v342_v37 }
  0xc9   :  { %v261_v44 = vpop.f32.mrf.mxu3  ;;  %513 = vst [vmem:[%s970_s3 + $0x28] sm:$0xff] %v512_v43  ;;  %v528_v45 = vld [vmem:[#allocation2 + $0x68] sm:$0xff]  ;;  %662 = vpow2.f32 %v358_v38  ;;  %v319_v46 = vmul.f32 -900.0, %v287_v40 }
  0xca   :  { %v262_v47 = vadd.f32 %v833_v36, %v261_v44  ;;  %529 = vst [vmem:[%s970_s3 + $0x68] sm:$0xff] %v528_v45  ;;  %664 = vpow2.f32 %v388_v41 }
  0xcb   :  { %v659_v48 = vpop.eup %658  ;;  %v374_v49 = vmul.f32 1.442695, %v319_v46 }
  0xcc   :  { %v295_v50 = vmul.f32 %v262_v47, %v262_v47  ;;  %v544_v51 = vld [vmem:[#allocation2 + $0xa8] sm:$0xff]  ;;  %414 = vst.msk [vmem:[#allocation2 + $0xb0] sm:$0xff] %vm54_vm0, %v659_v48 }
  0xcd   :  { %545 = vst [vmem:[%s970_s3 + $0xa8] sm:$0xff] %v544_v51  ;;  %666 = vpow2.f32 %v374_v49 }
  0xce   :  { %v327_v52 = vmul.f32 -900.0, %v295_v50  ;;  %v661_v53 = vpop.eup %660  ;;  %v514_v54 = vld [vmem:[#allocation2 + $0x30] sm:$0xff] }
  0xcf   :  { %v663_v36 = vpop.eup %662  ;;  %515 = vst [vmem:[%s970_s3 + $0x30] sm:$0xff] %v514_v54  ;;  %v530_v55 = vld [vmem:[#allocation2 + $0x70] sm:$0xff] }
  0xd0   :  { %v390_v56 = vmul.f32 1.442695, %v327_v52  ;;  %v665_v57 = vpop.eup %664  ;;  %531 = vst [vmem:[%s970_s3 + $0x70] sm:$0xff] %v530_v55 }
  0xd1   :  { %399 = vst.msk [vmem:[#allocation2 + $0x38] sm:$0xff] %vm54_vm0, %v661_v53 }
  0xd2   :  { %668 = vpow2.f32 %v390_v56  ;;  %407 = vst.msk [vmem:[#allocation2 + $0x78] sm:$0xff] %vm54_vm0, %v663_v36 }
  0xd3   :  { %v667_v58 = vpop.eup %666  ;;  %v546_v59 = vld [vmem:[#allocation2 + $0xb0] sm:$0xff] }
  0xd4   :  { %547 = vst [vmem:[%s970_s3 + $0xb0] sm:$0xff] %v546_v59 }
  0xd5   :  { %415 = vst.msk [vmem:[#allocation2 + $0xb8] sm:$0xff] %vm54_vm0, %v667_v58 }
  0xd8   :  { %v669_v60 = vpop.eup %668  ;;  %v516_v61 = vld [vmem:[#allocation2 + $0x38] sm:$0xff] }
  0xd9   :  { %517 = vst [vmem:[%s970_s3 + $0x38] sm:$0xff] %v516_v61  ;;  %v532_v62 = vld [vmem:[#allocation2 + $0x78] sm:$0xff] }
  0xda   :  { %533 = vst [vmem:[%s970_s3 + $0x78] sm:$0xff] %v532_v62 }
  0xdc   :  { %v548_v63 = vld [vmem:[#allocation2 + $0xb8] sm:$0xff] }
  0xdd   :  { %549 = vst [vmem:[%s970_s3 + $0xb8] sm:$0xff] %v548_v63 }

</bundles_post_ra>
